<compile_context>
chip_gen: v7x
topology: tpu7x:2x2x1
jax: 0.10.0
libtpu: 0.0.40
codegen_flags: <defaults>
</compile_context>

<pallas_src>
import functools

import jax
import jax.numpy as jnp
from jax.experimental import pallas as pl
from jax.experimental.pallas import tpu as pltpu

HIDDEN = 32
LANE = 128


def deepset_kernel(set_size, input_dim, latent_dim,
                   x_ref,                                   # (d_in, S, tile_b)
                   w1, b1, w2, b2, w3, b3,                  # phi (transposed)
                   w4, b4, w5, b5, w6, b6,                  # rho (transposed)
                   out_ref):                                # (out_dim, tile_b)
    x = x_ref[...]                                          # (d_in, S, tile_b) f32

    # Hoist weight loads used inside the unrolled S loop.
    w1v, b1v = w1[...], b1[...]                             # (32, d_in), (32, 1)
    w2v, b2v = w2[...], b2[...]                             # (32, 32),   (32, 1)

    # ---- phi (Linear -> ReLU -> Linear -> ReLU) per set element + mean -------
    # Static unrolled loop over the S set elements; pooling is pure VPU
    # accumulation of (32, tile_b) tiles — no reshape, no relayout.
    acc = None
    for s in range(set_size):
        xs = x[:, s, :]                                     # (d_in, tile_b)
        if input_dim == 1:
            # K=1 layer: (32,1)*(1,tile_b) broadcast outer product on the VPU.
            h = jnp.maximum(w1v * xs + b1v, 0.0)            # (32, tile_b)
        else:
            h = jnp.maximum(
                jnp.dot(w1v, xs, preferred_element_type=jnp.float32) + b1v, 0.0)
        h = jnp.maximum(
            jnp.dot(w2v, h, preferred_element_type=jnp.float32) + b2v, 0.0)
        acc = h if acc is None else acc + h
    pooled = acc * (1.0 / set_size)                         # (32, tile_b)

    # phi's last Linear commutes with the mean -> apply it on B rows only.
    z = jnp.dot(w3[...], pooled,
                preferred_element_type=jnp.float32) + b3[...]   # (latent, tile_b)

    # ---- rho: Linear -> ReLU -> Linear -> ReLU -> Linear ----------------------
    if latent_dim == 1:
        h = jnp.maximum(w4[...] * z + b4[...], 0.0)         # K=1: VPU path
    else:
        h = jnp.maximum(
            jnp.dot(w4[...], z, preferred_element_type=jnp.float32) + b4[...], 0.0)
    h = jnp.maximum(
        jnp.dot(w5[...], h, preferred_element_type=jnp.float32) + b5[...], 0.0)

    # Final layer: (out_dim, tile_b) — lane-dense store, no output padding.
    y = jnp.dot(w6[...], h, preferred_element_type=jnp.float32) + b6[...]
    out_ref[...] = y.astype(out_ref.dtype)


def deepset_forward(x, params):
    """x: (B, S, d_in) float32.  params: 6x (W (in,out), b (1,out)), PyTorch layout."""
    B, S, d_in = x.shape
    latent_dim = params[4].shape[-1]                        # w3: (32, latent)
    out_dim = params[10].shape[-1]                          # w6: (32, out)

    # Transpose all weights/biases once (tiny): W -> (out,in), b -> (out,1).
    wt = tuple(jnp.transpose(p) for p in params)

    # ---- tile selection -------------------------------------------------------
    # The lane dim of every streamed block is tile_b sets; a non-full lane block
    # must be a multiple of 128.  Use >= 2 grid steps whenever B > 128 (v7x
    # megacore) and up to 1024 sets per step to amortize per-step overhead.
    if B <= LANE:
        tile_b, b_pad = B, B                 # single tile; block dims == full dims
    else:
        tile_b = min(1024, max(LANE, (B // 2) // LANE * LANE))
        b_pad = pl.cdiv(B, tile_b) * tile_b

    # x -> (d_in, S, B_pad): lane-dense minor dim, S fills sublanes.  This is
    # the only wrapper-side pass over x (pad of < one tile fuses into it).
    x_t = jnp.transpose(x, (2, 1, 0))
    if b_pad > B:
        x_t = jnp.pad(x_t, ((0, 0), (0, 0), (0, b_pad - B)))

    grid = (b_pad // tile_b,)

    in_specs = [pl.BlockSpec((d_in, S, tile_b), lambda i: (0, 0, i))]
    # Weights/biases: full blocks, constant index map -> VMEM-resident.
    in_specs += [pl.BlockSpec(p.shape, lambda i: (0, 0)) for p in wt]
    out_spec = pl.BlockSpec((out_dim, tile_b), lambda i: (0, i))

    out_t = pl.pallas_call(
        functools.partial(deepset_kernel, S, d_in, latent_dim),
        out_shape=jax.ShapeDtypeStruct((out_dim, b_pad), x.dtype),
        grid=grid,
        in_specs=in_specs,
        out_specs=out_spec,
        compiler_params=pltpu.CompilerParams(
            dimension_semantics=("parallel",),
            # Working set is < 2 MiB even at tile_b=1024; explicit override kept
            # so v5e's 16 MiB default scoped limit is never a surprise.
            vmem_limit_bytes=32 * 1024 * 1024,
        ),
    )(x_t, *wt)

    # (out_dim, B_pad) -> (B, out_dim); for out_dim == 1 this is a free reshape.
    return jnp.transpose(out_t[:, :B])


def _init_linear(key, fan_in, fan_out):
    """PyTorch nn.Linear default init: U(-1/sqrt(fan_in), 1/sqrt(fan_in))."""
    k = 1.0 / jnp.sqrt(jnp.float32(fan_in))
    kw, kb = jax.random.split(key)
    w = jax.random.uniform(kw, (fan_in, fan_out), jnp.float32, minval=-k, maxval=k)
    b = jax.random.uniform(kb, (1, fan_out), jnp.float32, minval=-k, maxval=k)
    return w, b


def init_deepset_params(key, input_dim=1, latent_dim=1, output_dim=1):
    keys = jax.random.split(key, 6)
    dims = [(input_dim, HIDDEN), (HIDDEN, HIDDEN), (HIDDEN, latent_dim),
            (latent_dim, HIDDEN), (HIDDEN, HIDDEN), (HIDDEN, output_dim)]
    params = []
    for kk, (fi, fo) in zip(keys, dims):
        w, b = _init_linear(kk, fi, fo)
        params += [w, b]
    return tuple(params)


def deepset_reference(x, params):
    """Pure-JAX reference mirroring the PyTorch forward exactly."""
    w1, b1, w2, b2, w3, b3, w4, b4, w5, b5, w6, b6 = params
    h = jnp.maximum(x @ w1 + b1[0], 0.0)
    h = jnp.maximum(h @ w2 + b2[0], 0.0)
    z = h @ w3 + b3[0]
    zm = jnp.mean(z, axis=-2)
    h = jnp.maximum(zm @ w4 + b4[0], 0.0)
    h = jnp.maximum(h @ w5 + b5[0], 0.0)
    return h @ w6 + b6[0]


if __name__ == "__main__":
    key = jax.random.PRNGKey(0)
    k_param, k_x = jax.random.split(key)

    input_dim, latent_dim, output_dim = 1, 1, 1   # module defaults
    B, S = 2, 8                                   # 2 sets, 8 elements each

    params = init_deepset_params(k_param, input_dim, latent_dim, output_dim)
    x = jax.random.normal(k_x, (B, S, input_dim), jnp.float32)

    out = deepset_forward(x, params)
    out = jax.block_until_ready(out)

    ref = deepset_reference(x, params)
    assert out.shape == (B, output_dim), out.shape
    assert jnp.allclose(out, ref, atol=1e-5, rtol=1e-5), (out, ref)

    print("KERNEL_OK")
</pallas_src>

<mosaic_0001>
module attributes {stable_mosaic.version = 11 : i64} {
  func.func @deepset_kernel(%arg0: i32, %arg1: memref<1x8x2xf32, #tpu.memory_space<vmem>>, %arg2: memref<32x1xf32, #tpu.memory_space<vmem>>, %arg3: memref<32x1xf32, #tpu.memory_space<vmem>>, %arg4: memref<32x32xf32, #tpu.memory_space<vmem>>, %arg5: memref<32x1xf32, #tpu.memory_space<vmem>>, %arg6: memref<1x32xf32, #tpu.memory_space<vmem>>, %arg7: memref<1x1xf32, #tpu.memory_space<vmem>>, %arg8: memref<32x1xf32, #tpu.memory_space<vmem>>, %arg9: memref<32x1xf32, #tpu.memory_space<vmem>>, %arg10: memref<32x32xf32, #tpu.memory_space<vmem>>, %arg11: memref<32x1xf32, #tpu.memory_space<vmem>>, %arg12: memref<1x32xf32, #tpu.memory_space<vmem>>, %arg13: memref<1x1xf32, #tpu.memory_space<vmem>>, %arg14: memref<1x2xf32, #tpu.memory_space<vmem>>) attributes {dimension_semantics = [#tpu.dimension_semantics<parallel>], iteration_bounds = array<i64: 1>, scalar_prefetch = 0 : i64, scratch_operands = 0 : i64, tpu.core_type = #tpu.core_type<tc>, window_params = [{transform_indices = @transform_0, window_bounds = array<i64: 1, 8, 2>}, {pipeline_mode = #tpu.pipeline_mode<synchronous>, transform_indices = @transform_1, window_bounds = array<i64: 32, 1>}, {pipeline_mode = #tpu.pipeline_mode<synchronous>, transform_indices = @transform_2, window_bounds = array<i64: 32, 1>}, {pipeline_mode = #tpu.pipeline_mode<synchronous>, transform_indices = @transform_3, window_bounds = array<i64: 32, 32>}, {pipeline_mode = #tpu.pipeline_mode<synchronous>, transform_indices = @transform_4, window_bounds = array<i64: 32, 1>}, {pipeline_mode = #tpu.pipeline_mode<synchronous>, transform_indices = @transform_5, window_bounds = array<i64: 1, 32>}, {pipeline_mode = #tpu.pipeline_mode<synchronous>, transform_indices = @transform_6, window_bounds = array<i64: 1, 1>}, {pipeline_mode = #tpu.pipeline_mode<synchronous>, transform_indices = @transform_7, window_bounds = array<i64: 32, 1>}, {pipeline_mode = #tpu.pipeline_mode<synchronous>, transform_indices = @transform_8, window_bounds = array<i64: 32, 1>}, {pipeline_mode = #tpu.pipeline_mode<synchronous>, transform_indices = @transform_9, window_bounds = array<i64: 32, 32>}, {pipeline_mode = #tpu.pipeline_mode<synchronous>, transform_indices = @transform_10, window_bounds = array<i64: 32, 1>}, {pipeline_mode = #tpu.pipeline_mode<synchronous>, transform_indices = @transform_11, window_bounds = array<i64: 1, 32>}, {pipeline_mode = #tpu.pipeline_mode<synchronous>, transform_indices = @transform_12, window_bounds = array<i64: 1, 1>}, {transform_indices = @transform_13, window_bounds = array<i64: 1, 2>}]} {
    %c0 = arith.constant 0 : index
    %c0_0 = arith.constant 0 : index
    %c0_1 = arith.constant 0 : index
    %0 = vector.load %arg1[%c0, %c0_0, %c0_1] : memref<1x8x2xf32, #tpu.memory_space<vmem>>, vector<1x8x2xf32>
    %c0_2 = arith.constant 0 : index
    %c0_3 = arith.constant 0 : index
    %1 = vector.load %arg2[%c0_2, %c0_3] : memref<32x1xf32, #tpu.memory_space<vmem>>, vector<32x1xf32>
    %c0_4 = arith.constant 0 : index
    %c0_5 = arith.constant 0 : index
    %2 = vector.load %arg3[%c0_4, %c0_5] : memref<32x1xf32, #tpu.memory_space<vmem>>, vector<32x1xf32>
    %c0_6 = arith.constant 0 : index
    %c0_7 = arith.constant 0 : index
    %3 = vector.load %arg4[%c0_6, %c0_7] : memref<32x32xf32, #tpu.memory_space<vmem>>, vector<32x32xf32>
    %c0_8 = arith.constant 0 : index
    %c0_9 = arith.constant 0 : index
    %4 = vector.load %arg5[%c0_8, %c0_9] : memref<32x1xf32, #tpu.memory_space<vmem>>, vector<32x1xf32>
    %5 = vector.extract_strided_slice %0 {offsets = [0, 0, 0], sizes = [1, 1, 2], strides = [1, 1, 1]} : vector<1x8x2xf32> to vector<1x1x2xf32>
    %6 = vector.shape_cast %5 : vector<1x1x2xf32> to vector<1x2xf32>
    %7 = vector.broadcast %1 : vector<32x1xf32> to vector<32x2xf32>
    %8 = vector.broadcast %6 : vector<1x2xf32> to vector<32x2xf32>
    %9 = arith.mulf %7, %8 : vector<32x2xf32>
    %10 = vector.broadcast %2 : vector<32x1xf32> to vector<32x2xf32>
    %11 = arith.addf %9, %10 : vector<32x2xf32>
    %cst = arith.constant 0.000000e+00 : f32
    %12 = vector.broadcast %cst : f32 to vector<32x2xf32>
    %13 = arith.maximumf %11, %12 : vector<32x2xf32>
    %cst_10 = arith.constant dense<0.000000e+00> : vector<32x2xf32>
    %14 = tpu.matmul %3, %13, %cst_10 {dimension_numbers = #tpu.dot_dimension_numbers<[1], [0], [0], [1], [0, 0, 1, 1], [], []>} : vector<32x32xf32>, vector<32x2xf32>, vector<32x2xf32> -> vector<32x2xf32>
    %15 = vector.broadcast %4 : vector<32x1xf32> to vector<32x2xf32>
    %16 = arith.addf %14, %15 : vector<32x2xf32>
    %cst_11 = arith.constant 0.000000e+00 : f32
    %17 = vector.broadcast %cst_11 : f32 to vector<32x2xf32>
    %18 = arith.maximumf %16, %17 : vector<32x2xf32>
    %19 = vector.extract_strided_slice %0 {offsets = [0, 1, 0], sizes = [1, 1, 2], strides = [1, 1, 1]} : vector<1x8x2xf32> to vector<1x1x2xf32>
    %20 = vector.shape_cast %19 : vector<1x1x2xf32> to vector<1x2xf32>
    %21 = vector.broadcast %1 : vector<32x1xf32> to vector<32x2xf32>
    %22 = vector.broadcast %20 : vector<1x2xf32> to vector<32x2xf32>
    %23 = arith.mulf %21, %22 : vector<32x2xf32>
    %24 = vector.broadcast %2 : vector<32x1xf32> to vector<32x2xf32>
    %25 = arith.addf %23, %24 : vector<32x2xf32>
    %cst_12 = arith.constant 0.000000e+00 : f32
    %26 = vector.broadcast %cst_12 : f32 to vector<32x2xf32>
    %27 = arith.maximumf %25, %26 : vector<32x2xf32>
    %cst_13 = arith.constant dense<0.000000e+00> : vector<32x2xf32>
    %28 = tpu.matmul %3, %27, %cst_13 {dimension_numbers = #tpu.dot_dimension_numbers<[1], [0], [0], [1], [0, 0, 1, 1], [], []>} : vector<32x32xf32>, vector<32x2xf32>, vector<32x2xf32> -> vector<32x2xf32>
    %29 = vector.broadcast %4 : vector<32x1xf32> to vector<32x2xf32>
    %30 = arith.addf %28, %29 : vector<32x2xf32>
    %cst_14 = arith.constant 0.000000e+00 : f32
    %31 = vector.broadcast %cst_14 : f32 to vector<32x2xf32>
    %32 = arith.maximumf %30, %31 : vector<32x2xf32>
    %33 = arith.addf %18, %32 : vector<32x2xf32>
    %34 = vector.extract_strided_slice %0 {offsets = [0, 2, 0], sizes = [1, 1, 2], strides = [1, 1, 1]} : vector<1x8x2xf32> to vector<1x1x2xf32>
    %35 = vector.shape_cast %34 : vector<1x1x2xf32> to vector<1x2xf32>
    %36 = vector.broadcast %1 : vector<32x1xf32> to vector<32x2xf32>
    %37 = vector.broadcast %35 : vector<1x2xf32> to vector<32x2xf32>
    %38 = arith.mulf %36, %37 : vector<32x2xf32>
    %39 = vector.broadcast %2 : vector<32x1xf32> to vector<32x2xf32>
    %40 = arith.addf %38, %39 : vector<32x2xf32>
    %cst_15 = arith.constant 0.000000e+00 : f32
    %41 = vector.broadcast %cst_15 : f32 to vector<32x2xf32>
    %42 = arith.maximumf %40, %41 : vector<32x2xf32>
    %cst_16 = arith.constant dense<0.000000e+00> : vector<32x2xf32>
    %43 = tpu.matmul %3, %42, %cst_16 {dimension_numbers = #tpu.dot_dimension_numbers<[1], [0], [0], [1], [0, 0, 1, 1], [], []>} : vector<32x32xf32>, vector<32x2xf32>, vector<32x2xf32> -> vector<32x2xf32>
    %44 = vector.broadcast %4 : vector<32x1xf32> to vector<32x2xf32>
    %45 = arith.addf %43, %44 : vector<32x2xf32>
    %cst_17 = arith.constant 0.000000e+00 : f32
    %46 = vector.broadcast %cst_17 : f32 to vector<32x2xf32>
    %47 = arith.maximumf %45, %46 : vector<32x2xf32>
    %48 = arith.addf %33, %47 : vector<32x2xf32>
    %49 = vector.extract_strided_slice %0 {offsets = [0, 3, 0], sizes = [1, 1, 2], strides = [1, 1, 1]} : vector<1x8x2xf32> to vector<1x1x2xf32>
    %50 = vector.shape_cast %49 : vector<1x1x2xf32> to vector<1x2xf32>
    %51 = vector.broadcast %1 : vector<32x1xf32> to vector<32x2xf32>
    %52 = vector.broadcast %50 : vector<1x2xf32> to vector<32x2xf32>
    %53 = arith.mulf %51, %52 : vector<32x2xf32>
    %54 = vector.broadcast %2 : vector<32x1xf32> to vector<32x2xf32>
    %55 = arith.addf %53, %54 : vector<32x2xf32>
    %cst_18 = arith.constant 0.000000e+00 : f32
    %56 = vector.broadcast %cst_18 : f32 to vector<32x2xf32>
    %57 = arith.maximumf %55, %56 : vector<32x2xf32>
    %cst_19 = arith.constant dense<0.000000e+00> : vector<32x2xf32>
    %58 = tpu.matmul %3, %57, %cst_19 {dimension_numbers = #tpu.dot_dimension_numbers<[1], [0], [0], [1], [0, 0, 1, 1], [], []>} : vector<32x32xf32>, vector<32x2xf32>, vector<32x2xf32> -> vector<32x2xf32>
    %59 = vector.broadcast %4 : vector<32x1xf32> to vector<32x2xf32>
    %60 = arith.addf %58, %59 : vector<32x2xf32>
    %cst_20 = arith.constant 0.000000e+00 : f32
    %61 = vector.broadcast %cst_20 : f32 to vector<32x2xf32>
    %62 = arith.maximumf %60, %61 : vector<32x2xf32>
    %63 = arith.addf %48, %62 : vector<32x2xf32>
    %64 = vector.extract_strided_slice %0 {offsets = [0, 4, 0], sizes = [1, 1, 2], strides = [1, 1, 1]} : vector<1x8x2xf32> to vector<1x1x2xf32>
    %65 = vector.shape_cast %64 : vector<1x1x2xf32> to vector<1x2xf32>
    %66 = vector.broadcast %1 : vector<32x1xf32> to vector<32x2xf32>
    %67 = vector.broadcast %65 : vector<1x2xf32> to vector<32x2xf32>
    %68 = arith.mulf %66, %67 : vector<32x2xf32>
    %69 = vector.broadcast %2 : vector<32x1xf32> to vector<32x2xf32>
    %70 = arith.addf %68, %69 : vector<32x2xf32>
    %cst_21 = arith.constant 0.000000e+00 : f32
    %71 = vector.broadcast %cst_21 : f32 to vector<32x2xf32>
    %72 = arith.maximumf %70, %71 : vector<32x2xf32>
    %cst_22 = arith.constant dense<0.000000e+00> : vector<32x2xf32>
    %73 = tpu.matmul %3, %72, %cst_22 {dimension_numbers = #tpu.dot_dimension_numbers<[1], [0], [0], [1], [0, 0, 1, 1], [], []>} : vector<32x32xf32>, vector<32x2xf32>, vector<32x2xf32> -> vector<32x2xf32>
    %74 = vector.broadcast %4 : vector<32x1xf32> to vector<32x2xf32>
    %75 = arith.addf %73, %74 : vector<32x2xf32>
    %cst_23 = arith.constant 0.000000e+00 : f32
    %76 = vector.broadcast %cst_23 : f32 to vector<32x2xf32>
    %77 = arith.maximumf %75, %76 : vector<32x2xf32>
    %78 = arith.addf %63, %77 : vector<32x2xf32>
    %79 = vector.extract_strided_slice %0 {offsets = [0, 5, 0], sizes = [1, 1, 2], strides = [1, 1, 1]} : vector<1x8x2xf32> to vector<1x1x2xf32>
    %80 = vector.shape_cast %79 : vector<1x1x2xf32> to vector<1x2xf32>
    %81 = vector.broadcast %1 : vector<32x1xf32> to vector<32x2xf32>
    %82 = vector.broadcast %80 : vector<1x2xf32> to vector<32x2xf32>
    %83 = arith.mulf %81, %82 : vector<32x2xf32>
    %84 = vector.broadcast %2 : vector<32x1xf32> to vector<32x2xf32>
    %85 = arith.addf %83, %84 : vector<32x2xf32>
    %cst_24 = arith.constant 0.000000e+00 : f32
    %86 = vector.broadcast %cst_24 : f32 to vector<32x2xf32>
    %87 = arith.maximumf %85, %86 : vector<32x2xf32>
    %cst_25 = arith.constant dense<0.000000e+00> : vector<32x2xf32>
    %88 = tpu.matmul %3, %87, %cst_25 {dimension_numbers = #tpu.dot_dimension_numbers<[1], [0], [0], [1], [0, 0, 1, 1], [], []>} : vector<32x32xf32>, vector<32x2xf32>, vector<32x2xf32> -> vector<32x2xf32>
    %89 = vector.broadcast %4 : vector<32x1xf32> to vector<32x2xf32>
    %90 = arith.addf %88, %89 : vector<32x2xf32>
    %cst_26 = arith.constant 0.000000e+00 : f32
    %91 = vector.broadcast %cst_26 : f32 to vector<32x2xf32>
    %92 = arith.maximumf %90, %91 : vector<32x2xf32>
    %93 = arith.addf %78, %92 : vector<32x2xf32>
    %94 = vector.extract_strided_slice %0 {offsets = [0, 6, 0], sizes = [1, 1, 2], strides = [1, 1, 1]} : vector<1x8x2xf32> to vector<1x1x2xf32>
    %95 = vector.shape_cast %94 : vector<1x1x2xf32> to vector<1x2xf32>
    %96 = vector.broadcast %1 : vector<32x1xf32> to vector<32x2xf32>
    %97 = vector.broadcast %95 : vector<1x2xf32> to vector<32x2xf32>
    %98 = arith.mulf %96, %97 : vector<32x2xf32>
    %99 = vector.broadcast %2 : vector<32x1xf32> to vector<32x2xf32>
    %100 = arith.addf %98, %99 : vector<32x2xf32>
    %cst_27 = arith.constant 0.000000e+00 : f32
    %101 = vector.broadcast %cst_27 : f32 to vector<32x2xf32>
    %102 = arith.maximumf %100, %101 : vector<32x2xf32>
    %cst_28 = arith.constant dense<0.000000e+00> : vector<32x2xf32>
    %103 = tpu.matmul %3, %102, %cst_28 {dimension_numbers = #tpu.dot_dimension_numbers<[1], [0], [0], [1], [0, 0, 1, 1], [], []>} : vector<32x32xf32>, vector<32x2xf32>, vector<32x2xf32> -> vector<32x2xf32>
    %104 = vector.broadcast %4 : vector<32x1xf32> to vector<32x2xf32>
    %105 = arith.addf %103, %104 : vector<32x2xf32>
    %cst_29 = arith.constant 0.000000e+00 : f32
    %106 = vector.broadcast %cst_29 : f32 to vector<32x2xf32>
    %107 = arith.maximumf %105, %106 : vector<32x2xf32>
    %108 = arith.addf %93, %107 : vector<32x2xf32>
    %109 = vector.extract_strided_slice %0 {offsets = [0, 7, 0], sizes = [1, 1, 2], strides = [1, 1, 1]} : vector<1x8x2xf32> to vector<1x1x2xf32>
    %110 = vector.shape_cast %109 : vector<1x1x2xf32> to vector<1x2xf32>
    %111 = vector.broadcast %1 : vector<32x1xf32> to vector<32x2xf32>
    %112 = vector.broadcast %110 : vector<1x2xf32> to vector<32x2xf32>
    %113 = arith.mulf %111, %112 : vector<32x2xf32>
    %114 = vector.broadcast %2 : vector<32x1xf32> to vector<32x2xf32>
    %115 = arith.addf %113, %114 : vector<32x2xf32>
    %cst_30 = arith.constant 0.000000e+00 : f32
    %116 = vector.broadcast %cst_30 : f32 to vector<32x2xf32>
    %117 = arith.maximumf %115, %116 : vector<32x2xf32>
    %cst_31 = arith.constant dense<0.000000e+00> : vector<32x2xf32>
    %118 = tpu.matmul %3, %117, %cst_31 {dimension_numbers = #tpu.dot_dimension_numbers<[1], [0], [0], [1], [0, 0, 1, 1], [], []>} : vector<32x32xf32>, vector<32x2xf32>, vector<32x2xf32> -> vector<32x2xf32>
    %119 = vector.broadcast %4 : vector<32x1xf32> to vector<32x2xf32>
    %120 = arith.addf %118, %119 : vector<32x2xf32>
    %cst_32 = arith.constant 0.000000e+00 : f32
    %121 = vector.broadcast %cst_32 : f32 to vector<32x2xf32>
    %122 = arith.maximumf %120, %121 : vector<32x2xf32>
    %123 = arith.addf %108, %122 : vector<32x2xf32>
    %cst_33 = arith.constant 1.250000e-01 : f32
    %124 = vector.broadcast %cst_33 : f32 to vector<32x2xf32>
    %125 = arith.mulf %123, %124 : vector<32x2xf32>
    %c0_34 = arith.constant 0 : index
    %c0_35 = arith.constant 0 : index
    %126 = vector.load %arg6[%c0_34, %c0_35] : memref<1x32xf32, #tpu.memory_space<vmem>>, vector<1x32xf32>
    %cst_36 = arith.constant dense<0.000000e+00> : vector<1x2xf32>
    %127 = tpu.matmul %126, %125, %cst_36 {dimension_numbers = #tpu.dot_dimension_numbers<[1], [0], [0], [1], [0, 0, 1, 1], [], []>} : vector<1x32xf32>, vector<32x2xf32>, vector<1x2xf32> -> vector<1x2xf32>
    %c0_37 = arith.constant 0 : index
    %c0_38 = arith.constant 0 : index
    %128 = vector.load %arg7[%c0_37, %c0_38] : memref<1x1xf32, #tpu.memory_space<vmem>>, vector<1x1xf32>
    %129 = vector.broadcast %128 : vector<1x1xf32> to vector<1x2xf32>
    %130 = arith.addf %127, %129 : vector<1x2xf32>
    %c0_39 = arith.constant 0 : index
    %c0_40 = arith.constant 0 : index
    %131 = vector.load %arg8[%c0_39, %c0_40] : memref<32x1xf32, #tpu.memory_space<vmem>>, vector<32x1xf32>
    %132 = vector.broadcast %131 : vector<32x1xf32> to vector<32x2xf32>
    %133 = vector.broadcast %130 : vector<1x2xf32> to vector<32x2xf32>
    %134 = arith.mulf %132, %133 : vector<32x2xf32>
    %c0_41 = arith.constant 0 : index
    %c0_42 = arith.constant 0 : index
    %135 = vector.load %arg9[%c0_41, %c0_42] : memref<32x1xf32, #tpu.memory_space<vmem>>, vector<32x1xf32>
    %136 = vector.broadcast %135 : vector<32x1xf32> to vector<32x2xf32>
    %137 = arith.addf %134, %136 : vector<32x2xf32>
    %cst_43 = arith.constant 0.000000e+00 : f32
    %138 = vector.broadcast %cst_43 : f32 to vector<32x2xf32>
    %139 = arith.maximumf %137, %138 : vector<32x2xf32>
    %c0_44 = arith.constant 0 : index
    %c0_45 = arith.constant 0 : index
    %140 = vector.load %arg10[%c0_44, %c0_45] : memref<32x32xf32, #tpu.memory_space<vmem>>, vector<32x32xf32>
    %cst_46 = arith.constant dense<0.000000e+00> : vector<32x2xf32>
    %141 = tpu.matmul %140, %139, %cst_46 {dimension_numbers = #tpu.dot_dimension_numbers<[1], [0], [0], [1], [0, 0, 1, 1], [], []>} : vector<32x32xf32>, vector<32x2xf32>, vector<32x2xf32> -> vector<32x2xf32>
    %c0_47 = arith.constant 0 : index
    %c0_48 = arith.constant 0 : index
    %142 = vector.load %arg11[%c0_47, %c0_48] : memref<32x1xf32, #tpu.memory_space<vmem>>, vector<32x1xf32>
    %143 = vector.broadcast %142 : vector<32x1xf32> to vector<32x2xf32>
    %144 = arith.addf %141, %143 : vector<32x2xf32>
    %cst_49 = arith.constant 0.000000e+00 : f32
    %145 = vector.broadcast %cst_49 : f32 to vector<32x2xf32>
    %146 = arith.maximumf %144, %145 : vector<32x2xf32>
    %c0_50 = arith.constant 0 : index
    %c0_51 = arith.constant 0 : index
    %147 = vector.load %arg12[%c0_50, %c0_51] : memref<1x32xf32, #tpu.memory_space<vmem>>, vector<1x32xf32>
    %cst_52 = arith.constant dense<0.000000e+00> : vector<1x2xf32>
    %148 = tpu.matmul %147, %146, %cst_52 {dimension_numbers = #tpu.dot_dimension_numbers<[1], [0], [0], [1], [0, 0, 1, 1], [], []>} : vector<1x32xf32>, vector<32x2xf32>, vector<1x2xf32> -> vector<1x2xf32>
    %c0_53 = arith.constant 0 : index
    %c0_54 = arith.constant 0 : index
    %149 = vector.load %arg13[%c0_53, %c0_54] : memref<1x1xf32, #tpu.memory_space<vmem>>, vector<1x1xf32>
    %150 = vector.broadcast %149 : vector<1x1xf32> to vector<1x2xf32>
    %151 = arith.addf %148, %150 : vector<1x2xf32>
    %c0_55 = arith.constant 0 : index
    %c0_56 = arith.constant 0 : index
    %152 = vector.load %arg14[%c0_55, %c0_56] : memref<1x2xf32, #tpu.memory_space<vmem>>, vector<1x2xf32>
    tpu.vector_store %arg14[%c0_55, %c0_56], %151 {strides = array<i32>} : memref<1x2xf32, #tpu.memory_space<vmem>>, vector<1x2xf32>,
    return
  }
  func.func @transform_0(%arg0: i32) -> (i32, i32, i32) {
    %c0_i32 = arith.constant 0 : i32
    %c0_i32_0 = arith.constant 0 : i32
    %c0_i32_1 = arith.constant 0 : i32
    return %c0_i32, %c0_i32_0, %arg0 : i32, i32, i32
  }
  func.func @transform_1(%arg0: i32) -> (i32, i32) {
    %c0_i32 = arith.constant 0 : i32
    %c0_i32_0 = arith.constant 0 : i32
    %c0_i32_1 = arith.constant 0 : i32
    return %c0_i32, %c0_i32_0 : i32, i32
  }
  func.func @transform_2(%arg0: i32) -> (i32, i32) {
    %c0_i32 = arith.constant 0 : i32
    %c0_i32_0 = arith.constant 0 : i32
    %c0_i32_1 = arith.constant 0 : i32
    return %c0_i32, %c0_i32_0 : i32, i32
  }
  func.func @transform_3(%arg0: i32) -> (i32, i32) {
    %c0_i32 = arith.constant 0 : i32
    %c0_i32_0 = arith.constant 0 : i32
    %c0_i32_1 = arith.constant 0 : i32
    return %c0_i32, %c0_i32_0 : i32, i32
  }
  func.func @transform_4(%arg0: i32) -> (i32, i32) {
    %c0_i32 = arith.constant 0 : i32
    %c0_i32_0 = arith.constant 0 : i32
    %c0_i32_1 = arith.constant 0 : i32
    return %c0_i32, %c0_i32_0 : i32, i32
  }
  func.func @transform_5(%arg0: i32) -> (i32, i32) {
    %c0_i32 = arith.constant 0 : i32
    %c0_i32_0 = arith.constant 0 : i32
    %c0_i32_1 = arith.constant 0 : i32
    return %c0_i32, %c0_i32_0 : i32, i32
  }
  func.func @transform_6(%arg0: i32) -> (i32, i32) {
    %c0_i32 = arith.constant 0 : i32
    %c0_i32_0 = arith.constant 0 : i32
    %c0_i32_1 = arith.constant 0 : i32
    return %c0_i32, %c0_i32_0 : i32, i32
  }
  func.func @transform_7(%arg0: i32) -> (i32, i32) {
    %c0_i32 = arith.constant 0 : i32
    %c0_i32_0 = arith.constant 0 : i32
    %c0_i32_1 = arith.constant 0 : i32
    return %c0_i32, %c0_i32_0 : i32, i32
  }
  func.func @transform_8(%arg0: i32) -> (i32, i32) {
    %c0_i32 = arith.constant 0 : i32
    %c0_i32_0 = arith.constant 0 : i32
    %c0_i32_1 = arith.constant 0 : i32
    return %c0_i32, %c0_i32_0 : i32, i32
  }
  func.func @transform_9(%arg0: i32) -> (i32, i32) {
    %c0_i32 = arith.constant 0 : i32
    %c0_i32_0 = arith.constant 0 : i32
    %c0_i32_1 = arith.constant 0 : i32
    return %c0_i32, %c0_i32_0 : i32, i32
  }
  func.func @transform_10(%arg0: i32) -> (i32, i32) {
    %c0_i32 = arith.constant 0 : i32
    %c0_i32_0 = arith.constant 0 : i32
    %c0_i32_1 = arith.constant 0 : i32
    return %c0_i32, %c0_i32_0 : i32, i32
  }
  func.func @transform_11(%arg0: i32) -> (i32, i32) {
    %c0_i32 = arith.constant 0 : i32
    %c0_i32_0 = arith.constant 0 : i32
    %c0_i32_1 = arith.constant 0 : i32
    return %c0_i32, %c0_i32_0 : i32, i32
  }
  func.func @transform_12(%arg0: i32) -> (i32, i32) {
    %c0_i32 = arith.constant 0 : i32
    %c0_i32_0 = arith.constant 0 : i32
    %c0_i32_1 = arith.constant 0 : i32
    return %c0_i32, %c0_i32_0 : i32, i32
  }
  func.func @transform_13(%arg0: i32) -> (i32, i32) {
    %c0_i32 = arith.constant 0 : i32
    %c0_i32_0 = arith.constant 0 : i32
    return %c0_i32, %arg0 : i32, i32
  }
}

</mosaic_0001>

<bundles_post_ra>
// kernel: tpu_custom_call.1
= control target key start
LH: loop header
LB: loop body
LE: loop exit
PB: predicated region body
PF: predicated region fallthrough
CT: control target
= control target key end

     0   :  { %s2219_s0 = inlined_call_operand.vmem [shape: f32[1,8,2], index: 0, kind: input, shape index: {}]   ;;  %s2220_s1 = inlined_call_operand.vmem [shape: f32[32,1], index: 1, kind: input, shape index: {}]   ;;  %s2221_s2 = inlined_call_operand.vmem [shape: f32[32,1], index: 2, kind: input, shape index: {}]   ;;  %s2222_s3 = inlined_call_operand.vmem [shape: f32[32,32], index: 3, kind: input, shape index: {}]   ;;  %s2223_s4 = inlined_call_operand.vmem [shape: f32[32,1], index: 4, kind: input, shape index: {}]   ;;  %s2224_s5 = inlined_call_operand.vmem [shape: f32[1,32], index: 5, kind: input, shape index: {}]   ;;  %s2225_s6 = inlined_call_operand.<no memory space> [shape: f32[1,1], index: 6, kind: input, shape index: {}]   ;;  %s2226_s7 = inlined_call_operand.vmem [shape: f32[32,1], index: 7, kind: input, shape index: {}]   ;;  %s2227_s8 = inlined_call_operand.vmem [shape: f32[32,1], index: 8, kind: input, shape index: {}]   ;;  %s2228_s9 = inlined_call_operand.vmem [shape: f32[32,32], index: 9, kind: input, shape index: {}]   ;;  %s2229_s10 = inlined_call_operand.vmem [shape: f32[32,1], index: 10, kind: input, shape index: {}]   ;;  %s2230_s11 = inlined_call_operand.vmem [shape: f32[1,32], index: 11, kind: input, shape index: {}]   ;;  %s2231_s13 = inlined_call_operand.hbm [shape: f32[1,2], index: 13, kind: output, shape index: {}]   ;;  %s2232_s12 = inlined_call_operand.<no memory space> [shape: f32[1,1], index: 12, kind: input, shape index: {}]  }
   0x1   :  { %v18_v0 = vstv %s2225_s6  ;;  %v20_v1 = vstv %s2232_s12 }
   0x2   :  { %19 = vst [vmem:[#allocation2] sm:$0x1] %v18_v0  ;;  %21 = vst [vmem:[#allocation3] sm:$0x1] %v20_v1 }
   0x3   :  { %v54_v2 = vld [vmem:[%s2221_s2] sm:$0xff]  ;;  %v1771_v4 = vmov 0   ;;  %v55_v5 = vld [vmem:[%s2221_s2 + $0x8] sm:$0xff]  ;;  %v53_v7 = vld [vmem:[%s2220_s1 + $0x18] sm:$0xff] }
   0x4   :  { %v50_v3 = vld [vmem:[%s2220_s1] sm:$0xff]  ;;  %1746 = vset.pattern.permute.xlu1 %v1771_v4  ;;  %1745 = vset.pattern.permute.xlu0 %v1771_v4  ;;  %v51_v6 = vld [vmem:[%s2220_s1 + $0x8] sm:$0xff]  ;;  %v52_v8 = vld [vmem:[%s2220_s1 + $0x10] sm:$0xff] }
   0x5   :  { %96 = vperm.xlu1 %1746, %v54_v2   ;;  %68 = vperm.xlu0 %1745, %v50_v3  }
   0x9   :  { %101 = vperm.xlu1 %1746, %v55_v5   ;;  %73 = vperm.xlu0 %1745, %v51_v6  }
   0xa   :  { %22 = vsyncpa [#allocation5], 0  ;;  %v57_v9 = vld [vmem:[%s2221_s2 + $0x18] sm:$0xff]  ;;  %v56_v10 = vld [vmem:[%s2221_s2 + $0x10] sm:$0xff]  ;;  %vm142_vm0 = vcmask 261120   ;;  %v86_v30 = vlaneseq  ;;  %vm1773_vm1 = vmmov 0  }
   0xb   :  { %v63_v11 = vld [vmem:[%s2223_s4 + $0x8] sm:$0xff]  ;;  %v62_v12 = vld [vmem:[%s2223_s4] sm:$0xff]  ;;  %v65_v13 = vld [vmem:[%s2223_s4 + $0x18] sm:$0xff]  ;;  %s1775_s29 = smov [#allocation4]   ;;  %vm1372_vm2 = vcmask 8192  }
   0xc   :  { %v64_v14 = vld [vmem:[%s2223_s4 + $0x10] sm:$0xff]  ;;  %v1095_v15 = vld [vmem:[%s2226_s7] sm:$0xff]  ;;  %v1096_v19 = vld [vmem:[%s2226_s7 + $0x8] sm:$0xff]  ;;  %v1933_v31 = vshrl.u32 %v86_v30, 7  ;;  %s1380_s1 = sshll.u32 %s1775_s29, 4  ;;  %s1381_s1 = int_to_ptr.vmem [resolvable:$true] %s1380_s1 }
   0xd   :  { %83 = vperm.xlu1 %1746, %v53_v7   ;;  %78 = vperm.xlu0 %1745, %v52_v8   ;;  %v1012_v16 = vld [vmem:[#allocation2] sm:$0x1]  ;;  %v1097_v20 = vld [vmem:[%s2226_s7 + $0x10] sm:$0xff]  ;;  %v1128_v21 = vld [vmem:[%s2227_s8 + $0x8] sm:$0xff]  ;;  %s1747_s30 = scalar_lea.vmem %s1381_s1, 16  ;;  %s1751_s14 = scalar_lea.vmem %s1381_s1, 32 }
   0xe   :  { %v1894_v17 = vld [vmem:[%s2222_s3] sm:$0xff]  ;;  %v1129_v22 = vld [vmem:[%s2227_s8 + $0x10] sm:$0xff]  ;;  %v1098_v23 = vld [vmem:[%s2226_s7 + $0x18] sm:$0xff]  ;;  %v1936_v32 = vsub.s32 0, %v1933_v31  ;;  %v246_v33 = vsub.s32 1, %v1933_v31  ;;  %v355_v35 = vsub.s32 2, %v1933_v31  ;;  %p1748_p0 = scmp.ne.s32.totalorder %s1381_s1, %s1747_s30  ;;  %p1752_p1 = scmp.lt.s32.totalorder %s1381_s1, %s1381_s1 }
   0xf   :  { %1516 = vmatprep.mubr.msk.f32.mxu0 %vm142_vm0, %v1894_v17  ;;  %1530 = vmatprep.mubr.msk.f32.mxu1 %vm142_vm0, %v1894_v17  ;;  %v1127_v18 = vld [vmem:[%s2227_s8] sm:$0xff]  ;;  %v1130_v25 = vld [vmem:[%s2227_s8 + $0x18] sm:$0xff]  ;;  %v1165_v26 = vld [vmem:[%s2229_s10 + $0x10] sm:$0xff]  ;;  %v464_v36 = vsub.s32 3, %v1933_v31  ;;  %v573_v43 = vsub.s32 4, %v1933_v31  ;;  %v682_v46 = vsub.s32 5, %v1933_v31  ;;  %p1753_p2 = scmp.lt.s32.totalorder %s1751_s14, %s1747_s30 }
  0x10   :  { %v1163_v24 = vld [vmem:[%s2229_s10] sm:$0xff]  ;;  %v1164_v27 = vld [vmem:[%s2229_s10 + $0x8] sm:$0xff]  ;;  %v1166_v29 = vld [vmem:[%s2229_s10 + $0x18] sm:$0xff]  ;;  %v791_v47 = vsub.s32 6, %v1933_v31 }
  0x11   :  { %111 = vperm.xlu1 %1746, %v57_v9   ;;  %106 = vperm.xlu0 %1745, %v56_v10   ;;  %v1289_v28 = vld [vmem:[#allocation3] sm:$0x1]  ;;  %p1754_p3 = por %p1753_p2, %p1752_p1 }
  0x12   :  { %v1942_v34 = vld [vmem:[%s2219_s0] sm:$0xff] }
  0x13   :  { %v89_v37 = vrot.slane %v1942_v34, %v1936_v32  ;;  %v247_v38 = vrot.slane %v1942_v34, %v246_v33  ;;  %v356_v41 = vrot.slane %v1942_v34, %v355_v35  ;;  %v465_v42 = vrot.slane %v1942_v34, %v464_v36  ;;  %p1755_p4 = pnand %p1754_p3, %p1748_p0 }
  0x14   :  { %v1968_v53 = vrot.slane %v1942_v34, %v573_v43  ;;  %v1978_v61 = vrot.slane %v1942_v34, %v682_v46  ;;  %v1981_v62 = vrot.slane %v1942_v34, %v791_v47 }
  0x15   :  { %129 = vperm.xlu1 %1746, %v63_v11   ;;  %124 = vperm.xlu0 %1745, %v62_v12  }
  0x19   :  { %139 = vperm.xlu1 %1746, %v65_v13   ;;  %134 = vperm.xlu0 %1745, %v64_v14  }
  0x1d   :  { %1101 = vperm.xlu1 %1746, %v1095_v15   ;;  %1015 = vperm.xlu0 %1745, %v1012_v16  }
  0x21   :  { %1133 = vperm.xlu1 %1746, %v1127_v18   ;;  %1106 = vperm.xlu0 %1745, %v1096_v19  }
  0x25   :  { %1111 = vperm.xlu1 %1746, %v1097_v20   ;;  %1138 = vperm.xlu0 %1745, %v1128_v21  }
  0x29   :  { %1143 = vperm.xlu1 %1746, %v1129_v22   ;;  %1116 = vperm.xlu0 %1745, %v1098_v23  }
  0x2d   :  { %1169 = vperm.xlu1 %1746, %v1163_v24   ;;  %1148 = vperm.xlu0 %1745, %v1130_v25  }
  0x31   :  { %1179 = vperm.xlu1 %1746, %v1165_v26   ;;  %1174 = vperm.xlu0 %1745, %v1164_v27   ;;  %v900_v27 = vsub.s32 7, %v1933_v31 }
  0x35   :  { %1292 = vperm.xlu1 %1746, %v1289_v28   ;;  %1184 = vperm.xlu0 %1745, %v1166_v29  }
  0x84   :  { %v1949_v39 = vpop.permute.xlu1 %96  ;;  %v1951_v40 = vpop.permute.xlu0 %68 }
  0x85   :  { %v90_v44 = vmul.f32 %v89_v37, %v1951_v40  ;;  %v248_v45 = vmul.f32 %v247_v38, %v1951_v40  ;;  %v357_v51 = vmul.f32 %v356_v41, %v1951_v40  ;;  %v466_v52 = vmul.f32 %v465_v42, %v1951_v40 }
  0x86   :  { %v575_v4 = vmul.f32 %v1968_v53, %v1951_v40  ;;  %v684_v47 = vmul.f32 %v1978_v61, %v1951_v40 }
  0x87   :  { %v114_v50 = vadd.f32 %v1949_v39, %v90_v44  ;;  %v252_v56 = vadd.f32 %v248_v45, %v1949_v39  ;;  %v361_v2 = vadd.f32 %v357_v51, %v1949_v39  ;;  %v470_v3 = vadd.f32 %v466_v52, %v1949_v39 }
  0x88   :  { %v1960_v48 = vpop.permute.xlu1 %101  ;;  %v1962_v49 = vpop.permute.xlu0 %73 }
  0x89   :  { %v91_v54 = vmul.f32 %v89_v37, %v1962_v49  ;;  %v249_v55 = vmul.f32 %v247_v38, %v1962_v49  ;;  %v358_v57 = vmul.f32 %v356_v41, %v1962_v49  ;;  %v467_v58 = vmul.f32 %v465_v42, %v1962_v49 }
  0x8a   :  { %v118_v1 = vmax.f32 %v114_v50, 0.0  ;;  %v256_v6 = vmax.f32 %v252_v56, 0.0  ;;  %v576_v8 = vmul.f32 %v1968_v53, %v1962_v49  ;;  %v685_v31 = vmul.f32 %v1978_v61, %v1962_v49 }
  0x8b   :  { %v115_v59 = vadd.f32 %v1960_v48, %v91_v54  ;;  %v253_v60 = vadd.f32 %v249_v55, %v1960_v48  ;;  %v362_v11 = vadd.f32 %v358_v57, %v1960_v48  ;;  %v471_v12 = vadd.f32 %v467_v58, %v1960_v48 }
  0x8c   :  { %v1983_v63 = vpop.permute.xlu1 %83  ;;  %v1985_v0 = vpop.permute.xlu0 %78  ;;  %v365_v45 = vmax.f32 %v361_v2, 0.0  ;;  %v474_v46 = vmax.f32 %v470_v3, 0.0  ;;  %v580_v54 = vadd.f32 %v576_v8, %v1960_v48  ;;  %v901_v58 = vrot.slane %v1942_v34, %v900_v27 }
  0x8d   :  { %v119_v5 = vmax.f32 %v115_v59, 0.0  ;;  %v257_v7 = vmax.f32 %v253_v60, 0.0  ;;  %v92_v9 = vmul.f32 %v89_v37, %v1985_v0  ;;  %v93_v10 = vmul.f32 %v89_v37, %v1983_v63  ;;  %v2025_v60 = vld [vmem:[%s2222_s3 + $0x8] sm:$0xff] }
  0x8e   :  { %v250_v15 = vmul.f32 %v247_v38, %v1985_v0  ;;  %v251_v16 = vmul.f32 %v247_v38, %v1983_v63  ;;  %v359_v20 = vmul.f32 %v356_v41, %v1985_v0  ;;  %v360_v21 = vmul.f32 %v356_v41, %v1983_v63 }
  0x8f   :  { %v1656_v13 = vpack.c.bf16 %v119_v5, %v118_v1  ;;  %v1664_v14 = vpack.c.bf16 %v257_v7, %v256_v6  ;;  %v468_v22 = vmul.f32 %v465_v42, %v1985_v0  ;;  %v469_v23 = vmul.f32 %v465_v42, %v1983_v63 }
  0x90   :  { %v1999_v18 = vpop.permute.xlu1 %111  ;;  %v2001_v19 = vpop.permute.xlu0 %106  ;;  %v366_v29 = vmax.f32 %v362_v11, 0.0  ;;  %v475_v42 = vmax.f32 %v471_v12, 0.0  ;;  %v579_v1 = vadd.f32 %v575_v4, %v1949_v39  ;;  %v689_v2 = vadd.f32 %v685_v31, %v1960_v48 }
  0x91   :  { %1657 = vmatprep.subr.bf16.mxu0 %v1656_v13  ;;  %1665 = vmatprep.subr.bf16.mxu1 %v1664_v14  ;;  %v116_v24 = vadd.f32 %v2001_v19, %v92_v9  ;;  %v117_v25 = vadd.f32 %v1999_v18, %v93_v10  ;;  %v254_v26 = vadd.f32 %v250_v15, %v2001_v19  ;;  %v584_v7 = vmax.f32 %v580_v54, 0.0  ;;  %v2043_v10 = vld [vmem:[%s2222_s3 + $0x10] sm:$0xff] }
  0x92   :  { %1659 = vmatpush3.bf16.msra.mxu0 %v1656_v13  ;;  %1667 = vmatpush3.bf16.msra.mxu1 %v1664_v14  ;;  %v255_v28 = vadd.f32 %v251_v16, %v1999_v18  ;;  %v363_v30 = vadd.f32 %v359_v20, %v2001_v19  ;;  %v364_v33 = vadd.f32 %v360_v21, %v1999_v18  ;;  %v693_v13 = vmax.f32 %v689_v2, 0.0 }
  0x93   :  { %v120_v35 = vmax.f32 %v116_v24, 0.0  ;;  %v121_v36 = vmax.f32 %v117_v25, 0.0  ;;  %v258_v37 = vmax.f32 %v254_v26, 0.0  ;;  %v472_v38 = vadd.f32 %v468_v22, %v2001_v19 }
  0x94   :  { %v259_v41 = vmax.f32 %v255_v28, 0.0  ;;  %v473_v43 = vadd.f32 %v469_v23, %v1999_v18  ;;  %v367_v51 = vmax.f32 %v363_v30, 0.0  ;;  %v368_v52 = vmax.f32 %v364_v33, 0.0 }
  0x95   :  { %v1660_v44 = vpack.c.bf16 %v121_v36, %v120_v35  ;;  %v1672_v55 = vpack.c.bf16 %v366_v29, %v365_v45  ;;  %v476_v56 = vmax.f32 %v472_v38, 0.0  ;;  %v1680_v59 = vpack.c.bf16 %v475_v42, %v474_v46 }
  0x96   :  { %v1668_v50 = vpack.c.bf16 %v259_v41, %v258_v37  ;;  %v477_v57 = vmax.f32 %v473_v43, 0.0  ;;  %v688_v3 = vadd.f32 %v684_v47, %v1949_v39  ;;  %v577_v5 = vmul.f32 %v1968_v53, %v1985_v0 }
  0x97   :  { %1661 = vmatprep.subr.bf16.mxu0 %v1660_v44  ;;  %v578_v34 = vmul.f32 %v1968_v53, %v1983_v63  ;;  %v1676_v6 = vpack.c.bf16 %v368_v52, %v367_v51  ;;  %v686_v8 = vmul.f32 %v1978_v61, %v1985_v0  ;;  %v687_v4 = vmul.f32 %v1978_v61, %v1983_v63  ;;  %v2054_v61 = vld [vmem:[%s2222_s3 + $0x18] sm:$0xff] }
  0x98   :  { %1669 = vmatprep.subr.bf16.mxu1 %v1668_v50  ;;  %1663 = vmatpush3.bf16.msra.mxu0 %v1660_v44  ;;  %v1684_v9 = vpack.c.bf16 %v477_v57, %v476_v56  ;;  %v581_v53 = vadd.f32 %v577_v5, %v2001_v19  ;;  %v794_v12 = vmul.f32 %v1981_v62, %v1962_v49  ;;  %v583_v20 = vmax.f32 %v579_v1, 0.0  ;;  %v2137_v56 = vpop.permute.xlu0 %124 }
  0x99   :  { %1671 = vmatpush3.bf16.msra.mxu1 %v1668_v50  ;;  %1673 = vmatprep.subr.bf16.mxu0 %v1672_v55  ;;  %v582_v11 = vadd.f32 %v578_v34, %v1999_v18  ;;  %v690_v14 = vadd.f32 %v686_v8, %v2001_v19  ;;  %v691_v15 = vadd.f32 %v687_v4, %v1999_v18  ;;  %v692_v22 = vmax.f32 %v688_v3, 0.0 }
  0x9a   :  { %1681 = vmatprep.subr.bf16.mxu1 %v1680_v59  ;;  %v903_v16 = vmul.f32 %v901_v58, %v1962_v49  ;;  %v793_v21 = vmul.f32 %v1981_v62, %v1951_v40  ;;  %v902_v23 = vmul.f32 %v901_v58, %v1951_v40  ;;  %v1688_v49 = vpack.c.bf16 %v584_v7, %v583_v20 }
  0x9b   :  { %1517 = vmatmul.mubr.msk.f32.vlgmr.msra.gmra.mrb[0].mxu0 %vm142_vm0, %v2025_v60  ;;  %v585_v24 = vmax.f32 %v581_v53, 0.0  ;;  %v586_v25 = vmax.f32 %v582_v11, 0.0  ;;  %v798_v26 = vadd.f32 %v794_v12, %v1960_v48  ;;  %v1696_v27 = vpack.c.bf16 %v693_v13, %v692_v22 }
  0x9c   :  { %1531 = vmatmul.mubr.msk.f32.vlgmr.msra.gmra.mrb[0].mxu1 %vm142_vm0, %v2025_v60  ;;  %1675 = vmatpush3.bf16.msra.mxu0 %v1672_v55  ;;  %v694_v28 = vmax.f32 %v690_v14, 0.0  ;;  %v695_v29 = vmax.f32 %v691_v15, 0.0  ;;  %v907_v40 = vadd.f32 %v903_v16, %v1960_v48  ;;  %v797_v30 = vadd.f32 %v793_v21, %v1949_v39  ;;  %v2135_v55 = vpop.permute.xlu1 %129  ;;  %v2145_v7 = vpop.permute.xlu0 %134 }
  0x9d   :  { %1683 = vmatpush3.bf16.msra.mxu1 %v1680_v59  ;;  %1677 = vmatprep.subr.bf16.mxu0 %v1676_v6  ;;  %v795_v33 = vmul.f32 %v1981_v62, %v1985_v0  ;;  %v796_v35 = vmul.f32 %v1981_v62, %v1983_v63  ;;  %v906_v36 = vadd.f32 %v902_v23, %v1949_v39  ;;  %v802_v41 = vmax.f32 %v798_v26, 0.0 }
  0x9e   :  { %1685 = vmatprep.subr.bf16.mxu1 %v1684_v9  ;;  %1519 = vmatprep.mubr.msk.f32.mxu0 %vm142_vm0, %v2043_v10  ;;  %v904_v37 = vmul.f32 %v901_v58, %v1985_v0  ;;  %v905_v48 = vmul.f32 %v901_v58, %v1983_v63  ;;  %v1692_v38 = vpack.c.bf16 %v586_v25, %v585_v24  ;;  %v911_v0 = vmax.f32 %v907_v40, 0.0 }
  0x9f   :  { %1533 = vmatprep.mubr.msk.f32.mxu1 %vm142_vm0, %v2043_v10  ;;  %1520 = vmatmul.mubr.msk.f32.gmra.mrb[2].mxu0 %vm142_vm0, %v2054_v61  ;;  %v799_v62 = vadd.f32 %v795_v33, %v2001_v19  ;;  %v800_v42 = vadd.f32 %v796_v35, %v1999_v18  ;;  %v1700_v39 = vpack.c.bf16 %v695_v29, %v694_v28  ;;  %v801_v31 = vmax.f32 %v797_v30, 0.0 }
  0xa0   :  { %1534 = vmatmul.mubr.msk.f32.gmra.mrb[2].mxu1 %vm142_vm0, %v2054_v61  ;;  %1679 = vmatpush3.bf16.msra.mxu0 %v1676_v6  ;;  %v908_v63 = vadd.f32 %v904_v37, %v2001_v19  ;;  %v909_v43 = vadd.f32 %v905_v48, %v1999_v18  ;;  %v910_v44 = vmax.f32 %v906_v36, 0.0  ;;  %v1772_v54 = vmov 0.0|0.0   ;;  %v2142_v5 = vpop.permute.xlu1 %139 }
  0xa1   :  { %1687 = vmatpush3.bf16.msra.mxu1 %v1684_v9  ;;  %1689 = vmatprep.subr.bf16.mxu0 %v1688_v49  ;;  %v1704_v45 = vpack.c.bf16 %v802_v41, %v801_v31  ;;  %v803_v46 = vmax.f32 %v799_v62, 0.0  ;;  %v804_v47 = vmax.f32 %v800_v42, 0.0 }
  0xa2   :  { %1697 = vmatprep.subr.bf16.mxu1 %v1696_v27  ;;  %1544 = vmatprep.mubr.msk.f32.mxu0 %vm142_vm0, %v1894_v17  ;;  %v1712_v18 = vpack.c.bf16 %v911_v0, %v910_v44  ;;  %v912_v19 = vmax.f32 %v908_v63, 0.0  ;;  %v913_v50 = vmax.f32 %v909_v43, 0.0 }
  0xa3   :  { %1558 = vmatprep.mubr.msk.f32.mxu1 %vm142_vm0, %v1894_v17  ;;  %1545 = vmatmul.mubr.msk.f32.vlgmr.msra.gmra.mrb[4].mxu0 %vm142_vm0, %v2025_v60  ;;  %v1708_v51 = vpack.c.bf16 %v804_v47, %v803_v46 }
  0xa4   :  { %1559 = vmatmul.mubr.msk.f32.vlgmr.msra.gmra.mrb[4].mxu1 %vm142_vm0, %v2025_v60  ;;  %1691 = vmatpush3.bf16.msra.mxu0 %v1688_v49  ;;  %v1716_v52 = vpack.c.bf16 %v913_v50, %v912_v19 }
  0xa5   :  { %1699 = vmatpush3.bf16.msra.mxu1 %v1696_v27  ;;  %1693 = vmatprep.subr.bf16.mxu0 %v1692_v38 }
  0xa6   :  { %1701 = vmatprep.subr.bf16.mxu1 %v1700_v39  ;;  %1547 = vmatprep.mubr.msk.f32.mxu0 %vm142_vm0, %v2043_v10 }
  0xa7   :  { %1561 = vmatprep.mubr.msk.f32.mxu1 %vm142_vm0, %v2043_v10  ;;  %1548 = vmatmul.mubr.msk.f32.gmra.mrb[6].mxu0 %vm142_vm0, %v2054_v61 }
  0xa8   :  { %1562 = vmatmul.mubr.msk.f32.gmra.mrb[6].mxu1 %vm142_vm0, %v2054_v61  ;;  %1695 = vmatpush3.bf16.msra.mxu0 %v1692_v38 }
  0xa9   :  { %1703 = vmatpush3.bf16.msra.mxu1 %v1700_v39  ;;  %1705 = vmatprep.subr.bf16.mxu0 %v1704_v45 }
  0xaa   :  { %1713 = vmatprep.subr.bf16.mxu1 %v1712_v18  ;;  %1572 = vmatprep.mubr.msk.f32.mxu0 %vm142_vm0, %v1894_v17 }
  0xab   :  { %1586 = vmatprep.mubr.msk.f32.mxu1 %vm142_vm0, %v1894_v17  ;;  %1573 = vmatmul.mubr.msk.f32.vlgmr.msra.gmra.mrb[8].mxu0 %vm142_vm0, %v2025_v60 }
  0xac   :  { %1587 = vmatmul.mubr.msk.f32.vlgmr.msra.gmra.mrb[8].mxu1 %vm142_vm0, %v2025_v60  ;;  %1707 = vmatpush3.bf16.msra.mxu0 %v1704_v45 }
  0xad   :  { %1715 = vmatpush3.bf16.msra.mxu1 %v1712_v18  ;;  %1709 = vmatprep.subr.bf16.mxu0 %v1708_v51 }
  0xae   :  { %1717 = vmatprep.subr.bf16.mxu1 %v1716_v52  ;;  %1575 = vmatprep.mubr.msk.f32.mxu0 %vm142_vm0, %v2043_v10 }
  0xaf   :  { %1589 = vmatprep.mubr.msk.f32.mxu1 %vm142_vm0, %v2043_v10  ;;  %1576 = vmatmul.mubr.msk.f32.gmra.mrb[10].mxu0 %vm142_vm0, %v2054_v61 }
  0xb0   :  { %1590 = vmatmul.mubr.msk.f32.gmra.mrb[10].mxu1 %vm142_vm0, %v2054_v61  ;;  %1711 = vmatpush3.bf16.msra.mxu0 %v1708_v51 }
  0xb1   :  { %1719 = vmatpush3.bf16.msra.mxu1 %v1716_v52  ;;  %1600 = vmatprep.mubr.msk.f32.mxu0 %vm142_vm0, %v1894_v17 }
  0xb2   :  { %1614 = vmatprep.mubr.msk.f32.mxu1 %vm142_vm0, %v1894_v17  ;;  %1720 = vmatprep.subr.bf16.mxu0 %v1772_v54  ;;  %v1774_v17 = vmov 0.0  }
  0xb3   :  { %1601 = vmatmul.mubr.msk.f32.vlgmr.msra.gmra.mrb[12].mxu0 %vm142_vm0, %v2025_v60 }
  0xb4   :  { %1615 = vmatmul.mubr.msk.f32.vlgmr.msra.gmra.mrb[12].mxu1 %vm142_vm0, %v2025_v60  ;;  %1603 = vmatprep.mubr.msk.f32.mxu0 %vm142_vm0, %v2043_v10 }
  0xb5   :  { %1617 = vmatprep.mubr.msk.f32.mxu1 %vm142_vm0, %v2043_v10 }
  0xb7   :  { %1604 = vmatmul.mubr.msk.f32.gmra.mrb[14].mxu0 %vm142_vm0, %v2054_v61 }
  0xb8   :  { %1618 = vmatmul.mubr.msk.f32.gmra.mrb[14].mxu1 %vm142_vm0, %v2054_v61  ;;  %1628 = vmatprep.mubr.msk.f32.mxu0 %vm1773_vm1, %v1774_v17 }
 0x16e   :  { %v1518_v57 = vpop.f32.mrb[0].mxu0 }
 0x16f   :  { %v227_v58 = vadd.f32 %v1518_v57, %v2135_v55  ;;  %v1532_v59 = vpop.f32.mrb[0].mxu1  ;;  %v221_v60 = vpop.f32.mrb[1].mxu0 }
 0x170   :  { %v332_v1 = vadd.f32 %v1532_v59, %v2135_v55  ;;  %v222_v2 = vadd.f32 %v221_v60, %v2137_v56  ;;  %v326_v3 = vpop.f32.mrb[1].mxu1 }
 0x171   :  { %v241_v34 = vmax.f32 %v227_v58, 0.0  ;;  %v327_v6 = vadd.f32 %v326_v3, %v2137_v56 }
 0x172   :  { %v346_v8 = vmax.f32 %v332_v1, 0.0  ;;  %v240_v4 = vmax.f32 %v222_v2, 0.0  ;;  %v1521_v9 = vpop.f32.mrb[2].mxu0 }
 0x173   :  { %v345_v10 = vmax.f32 %v327_v6, 0.0  ;;  %v237_v53 = vadd.f32 %v1521_v9, %v2142_v5  ;;  %v1535_v11 = vpop.f32.mrb[2].mxu1  ;;  %v231_v12 = vpop.f32.mrb[3].mxu0 }
 0x174   :  { %v350_v61 = vadd.f32 %v346_v8, %v241_v34  ;;  %v342_v13 = vadd.f32 %v1535_v11, %v2142_v5  ;;  %v232_v14 = vadd.f32 %v231_v12, %v2145_v7  ;;  %v336_v15 = vpop.f32.mrb[3].mxu1 }
 0x175   :  { %v349_v16 = vadd.f32 %v345_v10, %v240_v4  ;;  %v243_v20 = vmax.f32 %v237_v53, 0.0  ;;  %v337_v21 = vadd.f32 %v336_v15, %v2145_v7 }
 0x176   :  { %v348_v22 = vmax.f32 %v342_v13, 0.0  ;;  %v242_v23 = vmax.f32 %v232_v14, 0.0  ;;  %v1546_v49 = vpop.f32.mrb[4].mxu0 }
 0x177   :  { %v347_v24 = vmax.f32 %v337_v21, 0.0  ;;  %v441_v25 = vadd.f32 %v1546_v49, %v2135_v55  ;;  %v1560_v26 = vpop.f32.mrb[4].mxu1  ;;  %v435_v27 = vpop.f32.mrb[5].mxu0 }
 0x178   :  { %v352_v28 = vadd.f32 %v348_v22, %v243_v20  ;;  %v550_v29 = vadd.f32 %v1560_v26, %v2135_v55  ;;  %v436_v40 = vadd.f32 %v435_v27, %v2137_v56  ;;  %v544_v30 = vpop.f32.mrb[5].mxu1 }
 0x179   :  { %v351_v33 = vadd.f32 %v347_v24, %v242_v23  ;;  %v455_v35 = vmax.f32 %v441_v25, 0.0  ;;  %v545_v36 = vadd.f32 %v544_v30, %v2137_v56 }
 0x17a   :  { %v454_v37 = vmax.f32 %v436_v40, 0.0  ;;  %v1549_v48 = vpop.f32.mrb[6].mxu0  ;;  %v564_v41 = vmax.f32 %v550_v29, 0.0 }
 0x17b   :  { %v459_v38 = vadd.f32 %v455_v35, %v350_v61  ;;  %v451_v62 = vadd.f32 %v1549_v48, %v2142_v5  ;;  %v1563_v42 = vpop.f32.mrb[6].mxu1  ;;  %v445_v39 = vpop.f32.mrb[7].mxu0  ;;  %v563_v63 = vmax.f32 %v545_v36, 0.0 }
 0x17c   :  { %v458_v0 = vadd.f32 %v454_v37, %v349_v16  ;;  %v560_v43 = vadd.f32 %v1563_v42, %v2142_v5  ;;  %v446_v31 = vadd.f32 %v445_v39, %v2145_v7  ;;  %v554_v44 = vpop.f32.mrb[7].mxu1 }
 0x17d   :  { %v568_v45 = vadd.f32 %v564_v41, %v459_v38  ;;  %v457_v46 = vmax.f32 %v451_v62, 0.0  ;;  %v555_v47 = vadd.f32 %v554_v44, %v2145_v7 }
 0x17e   :  { %v567_v18 = vadd.f32 %v563_v63, %v458_v0  ;;  %v456_v19 = vmax.f32 %v446_v31, 0.0  ;;  %v1574_v50 = vpop.f32.mrb[8].mxu0  ;;  %v566_v52 = vmax.f32 %v560_v43, 0.0 }
 0x17f   :  { %v461_v51 = vadd.f32 %v457_v46, %v352_v28  ;;  %v659_v57 = vadd.f32 %v1574_v50, %v2135_v55  ;;  %v1588_v58 = vpop.f32.mrb[8].mxu1  ;;  %v653_v59 = vpop.f32.mrb[9].mxu0  ;;  %v565_v1 = vmax.f32 %v555_v47, 0.0 }
 0x180   :  { %v460_v60 = vadd.f32 %v456_v19, %v351_v33  ;;  %v768_v2 = vadd.f32 %v1588_v58, %v2135_v55  ;;  %v654_v3 = vadd.f32 %v653_v59, %v2137_v56  ;;  %v762_v34 = vpop.f32.mrb[9].mxu1 }
 0x181   :  { %v570_v6 = vadd.f32 %v566_v52, %v461_v51  ;;  %v673_v8 = vmax.f32 %v659_v57, 0.0  ;;  %v763_v4 = vadd.f32 %v762_v34, %v2137_v56 }
 0x182   :  { %v569_v9 = vadd.f32 %v565_v1, %v460_v60  ;;  %v672_v10 = vmax.f32 %v654_v3, 0.0  ;;  %v1577_v53 = vpop.f32.mrb[10].mxu0  ;;  %v782_v12 = vmax.f32 %v768_v2, 0.0 }
 0x183   :  { %v677_v11 = vadd.f32 %v673_v8, %v568_v45  ;;  %v669_v61 = vadd.f32 %v1577_v53, %v2142_v5  ;;  %v1591_v13 = vpop.f32.mrb[10].mxu1  ;;  %v663_v14 = vpop.f32.mrb[11].mxu0  ;;  %v781_v16 = vmax.f32 %v763_v4, 0.0  ;;  %v1159_v53 = vld [vmem:[%s2228_s9] sm:$0xff] }
 0x184   :  { %v676_v15 = vadd.f32 %v672_v10, %v567_v18  ;;  %v778_v20 = vadd.f32 %v1591_v13, %v2142_v5  ;;  %v664_v21 = vadd.f32 %v663_v14, %v2145_v7  ;;  %v772_v22 = vpop.f32.mrb[11].mxu1  ;;  %1639 = vmatprep.mubr.msk.f32.mxu1 %vm142_vm0, %v1159_v53 }
 0x185   :  { %v786_v23 = vadd.f32 %v782_v12, %v677_v11  ;;  %v675_v49 = vmax.f32 %v669_v61, 0.0  ;;  %v773_v24 = vadd.f32 %v772_v22, %v2145_v7  ;;  %v1016_v11 = vpop.permute.xlu0 %1015  ;;  %v1102_v12 = vpop.permute.xlu1 %1101 }
 0x186   :  { %v785_v25 = vadd.f32 %v781_v16, %v676_v15  ;;  %v674_v26 = vmax.f32 %v664_v21, 0.0  ;;  %v1602_v27 = vpop.f32.mrb[12].mxu0  ;;  %v784_v29 = vmax.f32 %v778_v20, 0.0  ;;  %v1021_v15 = vrot.slane %v1016_v11, %v1936_v32 }
 0x187   :  { %v679_v28 = vadd.f32 %v675_v49, %v570_v6  ;;  %v877_v40 = vadd.f32 %v1602_v27, %v2135_v55  ;;  %v1616_v30 = vpop.f32.mrb[12].mxu1  ;;  %v871_v33 = vpop.f32.mrb[13].mxu0  ;;  %v783_v36 = vmax.f32 %v773_v24, 0.0 }
 0x188   :  { %v678_v35 = vadd.f32 %v674_v26, %v569_v9  ;;  %v986_v37 = vadd.f32 %v1616_v30, %v2135_v55  ;;  %v872_v48 = vadd.f32 %v871_v33, %v2137_v56  ;;  %v980_v38 = vpop.f32.mrb[13].mxu1 }
 0x189   :  { %v788_v41 = vadd.f32 %v784_v29, %v679_v28  ;;  %v891_v62 = vmax.f32 %v877_v40, 0.0  ;;  %v981_v42 = vadd.f32 %v980_v38, %v2137_v56  ;;  %v1107_v61 = vpop.permute.xlu0 %1106  ;;  %v1134_v13 = vpop.permute.xlu1 %1133 }
 0x18a   :  { %v787_v39 = vadd.f32 %v783_v36, %v678_v35  ;;  %v890_v0 = vmax.f32 %v872_v48, 0.0  ;;  %v1605_v63 = vpop.f32.mrb[14].mxu0  ;;  %v1000_v31 = vmax.f32 %v986_v37, 0.0 }
 0x18b   :  { %v895_v43 = vadd.f32 %v891_v62, %v786_v23  ;;  %v887_v44 = vadd.f32 %v1605_v63, %v2142_v5  ;;  %v1619_v45 = vpop.f32.mrb[14].mxu1  ;;  %v881_v46 = vpop.f32.mrb[15].mxu0  ;;  %v999_v18 = vmax.f32 %v981_v42, 0.0  ;;  %v1160_v62 = vld [vmem:[%s2228_s9 + $0x8] sm:$0xff]  ;;  %v1161_v42 = vld [vmem:[%s2228_s9 + $0x10] sm:$0xff] }
 0x18c   :  { %v894_v47 = vadd.f32 %v890_v0, %v785_v25  ;;  %v996_v55 = vadd.f32 %v1619_v45, %v2142_v5  ;;  %v882_v19 = vadd.f32 %v881_v46, %v2145_v7  ;;  %v990_v50 = vpop.f32.mrb[15].mxu1 }
 0x18d   :  { %v1004_v51 = vadd.f32 %v1000_v31, %v895_v43  ;;  %v893_v52 = vmax.f32 %v887_v44, 0.0  ;;  %v991_v56 = vadd.f32 %v990_v50, %v2145_v7  ;;  %v1011_v7 = vld [vmem:[%s2224_s5] sm:$0x1]  ;;  %v1139_v14 = vpop.permute.xlu0 %1138  ;;  %v1112_v16 = vpop.permute.xlu1 %1111 }
 0x18e   :  { %v1003_v57 = vadd.f32 %v999_v18, %v894_v47  ;;  %v892_v58 = vmax.f32 %v882_v19, 0.0  ;;  %v1002_v1 = vmax.f32 %v996_v55, 0.0 }
 0x18f   :  { %v1008_v59 = vmul.f32 0.125, %v1004_v51  ;;  %v897_v60 = vadd.f32 %v893_v52, %v788_v41  ;;  %v1001_v34 = vmax.f32 %v991_v56, 0.0 }
 0x190   :  { %v1007_v2 = vmul.f32 0.125, %v1003_v57  ;;  %v896_v3 = vadd.f32 %v892_v58, %v787_v39  ;;  %v1162_v39 = vld [vmem:[%s2228_s9 + $0x18] sm:$0xff] }
 0x191   :  { %v1006_v6 = vadd.f32 %v1002_v1, %v897_v60  ;;  %v1117_v20 = vpop.permute.xlu0 %1116  ;;  %v1144_v27 = vpop.permute.xlu1 %1143  ;;  %v1288_v60 = vld [vmem:[%s2230_s11] sm:$0x1] }
 0x192   :  { %v1721_v8 = vpack.c.bf16 %v1008_v59, %v1007_v2  ;;  %v1005_v4 = vadd.f32 %v1001_v34, %v896_v3 }
 0x193   :  { %v1010_v9 = vmul.f32 0.125, %v1006_v6 }
 0x194   :  { %v1009_v5 = vmul.f32 0.125, %v1005_v4  ;;  %1722 = vmatpush3.bf16.msra.mxu0 %v1721_v8 }
 0x195   :  { %1723 = vmatprep.subr.bf16.mxu0 %v1772_v54  ;;  %v1149_v28 = vpop.permute.xlu0 %1148  ;;  %v1170_v63 = vpop.permute.xlu1 %1169 }
 0x196   :  { %v1724_v10 = vpack.c.bf16 %v1010_v9, %v1009_v5 }
 0x198   :  { %1725 = vmatpush3.bf16.msra.mxu0 %v1724_v10 }
 0x199   :  { %1734 = vmatprep.subr.bf16.mxu0 %v1772_v54  ;;  %v1175_v0 = vpop.permute.xlu0 %1174  ;;  %v1180_v19 = vpop.permute.xlu1 %1179 }
 0x19b   :  { %1629 = vmatmul.mubr.msk.f32.vlgmr.msra.gmra.mrb[16].mxu0 %vm142_vm0, %v1011_v7 }
 0x19c   :  { %1653 = vmatprep.mubr.msk.f32.mxu0 %vm1773_vm1, %v1774_v17 }
 0x19d   :  { %v1185_v47 = vpop.permute.xlu0 %1184  ;;  %v1293_v1 = vpop.permute.xlu1 %1292 }
 0x19e   :  { %v1298_v2 = vrot.slane %v1293_v1, %v1936_v32 }
 0x26e   :  { %v1091_v21 = vpop.f32.mrb[16].mxu0 }
 0x26f   :  { %v1092_v22 = vadd.f32 %v1091_v21, %v1021_v15  ;;  %v1630_v23 = vpop.f32.mrb[17].mxu0 }
 0x271   :  { %v1122_v17 = vrot.slane %v1092_v22, %v1936_v32 }
 0x273   :  { %v1123_v49 = vmul.f32 %v1122_v17, %v1102_v12  ;;  %v1124_v24 = vmul.f32 %v1122_v17, %v1107_v61  ;;  %v1125_v25 = vmul.f32 %v1122_v17, %v1112_v16  ;;  %v1126_v26 = vmul.f32 %v1122_v17, %v1117_v20 }
 0x275   :  { %v1151_v29 = vadd.f32 %v1134_v13, %v1123_v49  ;;  %v1152_v40 = vadd.f32 %v1139_v14, %v1124_v24  ;;  %v1153_v30 = vadd.f32 %v1144_v27, %v1125_v25  ;;  %v1154_v33 = vadd.f32 %v1149_v28, %v1126_v26 }
 0x277   :  { %v1155_v35 = vmax.f32 %v1151_v29, 0.0  ;;  %v1156_v36 = vmax.f32 %v1152_v40, 0.0  ;;  %v1157_v37 = vmax.f32 %v1153_v30, 0.0  ;;  %v1158_v48 = vmax.f32 %v1154_v33, 0.0 }
 0x279   :  { %v1726_v38 = vpack.c.bf16 %v1156_v36, %v1155_v35  ;;  %v1730_v41 = vpack.c.bf16 %v1158_v48, %v1157_v37 }
 0x27b   :  { %1727 = vmatprep.subr.bf16.mxu1 %v1726_v38 }
 0x27c   :  { %1729 = vmatpush3.bf16.msra.mxu1 %v1726_v38 }
 0x27d   :  { %1731 = vmatprep.subr.bf16.mxu1 %v1730_v41 }
 0x280   :  { %1733 = vmatpush3.bf16.msra.mxu1 %v1730_v41 }
 0x283   :  { %1640 = vmatmul.mubr.msk.f32.vlgmr.msra.gmra.mrb[16].mxu1 %vm142_vm0, %v1160_v62 }
 0x284   :  { %1642 = vmatprep.mubr.msk.f32.mxu1 %vm142_vm0, %v1161_v42 }
 0x287   :  { %1643 = vmatmul.mubr.msk.f32.gmra.mrb[18].mxu1 %vm142_vm0, %v1162_v39 }
 0x356   :  { %v1641_v43 = vpop.f32.mrb[16].mxu1 }
 0x357   :  { %v1271_v31 = vadd.f32 %v1641_v43, %v1175_v0  ;;  %v1265_v44 = vpop.f32.mrb[17].mxu1 }
 0x358   :  { %v1266_v45 = vadd.f32 %v1265_v44, %v1170_v63 }
 0x359   :  { %v1285_v46 = vmax.f32 %v1271_v31, 0.0 }
 0x35a   :  { %v1284_v18 = vmax.f32 %v1266_v45, 0.0  ;;  %v1644_v55 = vpop.f32.mrb[18].mxu1 }
 0x35b   :  { %v1281_v50 = vadd.f32 %v1644_v55, %v1185_v47  ;;  %v1275_v51 = vpop.f32.mrb[19].mxu1 }
 0x35c   :  { %v1735_v52 = vpack.c.bf16 %v1285_v46, %v1284_v18  ;;  %v1276_v56 = vadd.f32 %v1275_v51, %v1180_v19 }
 0x35d   :  { %v1287_v57 = vmax.f32 %v1281_v50, 0.0 }
 0x35e   :  { %v1286_v58 = vmax.f32 %v1276_v56, 0.0  ;;  %1736 = vmatpush3.bf16.msra.mxu0 %v1735_v52 }
 0x35f   :  { %1737 = vmatprep.subr.bf16.mxu0 %v1772_v54 }
 0x360   :  { %v1738_v59 = vpack.c.bf16 %v1287_v57, %v1286_v58 }
 0x362   :  { %1739 = vmatpush3.bf16.msra.mxu0 %v1738_v59 }
 0x365   :  { %1654 = vmatmul.mubr.msk.f32.vlgmr.msra.gmra.mrb[18].mxu0 %vm142_vm0, %v1288_v60 }
 0x438   :  { %v1368_v3 = vpop.f32.mrb[18].mxu0 }
 0x439   :  { %v1369_v34 = vadd.f32 %v1368_v3, %v1298_v2  ;;  %v1655_v6 = vpop.f32.mrb[19].mxu0 }
 0x43b   :  { %1373 = vst.msk [vmem:[#allocation4] sm:$0x1] %vm1372_vm2, %v1369_v34 }
 0x43c   :  { %1758 = shalt.err (!%p1755_p4)
}
 0x43d   :  { %s1759_s2 = scalar_lea.hbm %s2231_s13, 16 }
 0x43e   :  { %p1760_p5 = scmp.ne.s32.totalorder %s2231_s13, %s1759_s2  ;;  %p1763_p6 = scmp.lt.u32.totalorder %s1759_s2, %s2231_s13 }
 0x440   :  { %p1765_p7 = pnand %p1763_p6, %p1760_p5 }
 0x442   :  { %1768 = shalt.err (!%p1765_p7)
}
 0x443   :  { %1383 = dma.vmem_to_hbm [thread:$0]  %s1381_s1, 16, %s2231_s13, [#allocation5]  }
 0x444   :  { %1769 = dma.done.wait [#allocation5], 16  }
 0x445   :  { %1770 = vsyncadd [#allocation5], 4294967280 }
 0x446   :  { %1387 = vsyncpa [#allocation5], 1 }

</bundles_post_ra>
